<compile_context>
chip_gen: v7x
topology: tpu7x:2x2x1
jax: 0.10.0
libtpu: 0.0.40
codegen_flags: <defaults>
</compile_context>

<pallas_src>
import functools

import jax
import jax.numpy as jnp
from jax.experimental import pallas as pl
from jax.experimental.pallas import tpu as pltpu

_LANE = 128


# ----------------------------- hardware plan ------------------------------- #
def _budgets():
    """(target feature-block bytes, vmem_limit_bytes), generation aware."""
    try:
        cap = int(pltpu.get_tpu_info().vmem_capacity_bytes)
    except Exception:
        cap = 64 << 20                       # conservative (v7x-sized) fallback
    if cap >= (96 << 20):                    # v5e / v6e: 128 MiB physical VMEM
        blk, limit = 12 << 20, 80 << 20
    else:                                    # v7x: 64 MiB physical VMEM
        blk, limit = 5 << 20, 40 << 20
    return blk, max(min(limit, cap - (12 << 20)), 16 << 20)


def _num_tensorcores():
    """2 on v7x (2 TensorCores/chip) so the K reduction can be core-split."""
    try:
        kind = jax.devices()[0].device_kind.lower()
    except Exception:
        return 1
    return 2 if "v7" in kind else 1


def _prep(x):
    """NCHW -> feature matrix + tiling plan (avoids host-side HBM passes)."""
    a, b, c, d = x.shape
    M, K = a * b, c * d
    denom = float(a * b * c * d)
    blk_bytes, vmem_limit = _budgets()

    # Pad M (output lane dim / MXU fill) only when nearly free (<= 12.5% extra
    # streamed bytes).  Zero feature rows leave the Gram and the MSE unchanged.
    M_lane = pl.cdiv(M, _LANE) * _LANE
    M_pad = M_lane if M_lane * 8 <= M * 9 else M

    # VMEM residency: f32 Gram accumulator + resident f32 target block.
    resident = 2 * M_pad * M_pad * 4
    stream_budget = max(vmem_limit - resident - (4 << 20), 2 << 20)

    def col_cap(itemsize):
        cap = min(blk_bytes, stream_budget // 2) // (M_pad * itemsize)
        return max(_LANE, cap // _LANE * _LANE)

    feats = x.reshape(M, K)
    itemsize = feats.dtype.itemsize
    single_block = (M_pad == M) and (K <= col_cap(itemsize))
    needs_copy = (M_pad != M) or (not single_block and K % _LANE != 0)

    if needs_copy:
        # A padded copy is materialized anyway: fuse the bf16 downcast into it
        # so the kernel streams half the bytes and feeds the MXU native bf16.
        K_pad = pl.cdiv(K, _LANE) * _LANE
        feats = jnp.pad(feats.astype(jnp.bfloat16),
                        ((0, M_pad - M), (0, K_pad - K)))
        itemsize = 2
    else:
        # No extra host-side pad/cast HBM pass: stream the input dtype as-is
        # and downcast to bf16 inside the kernel before the MXU.
        # TODO(synk): have the upstream layer emit bf16 features to halve the
        # streamed bytes outright.
        K_pad = K

    cap = col_cap(itemsize)
    if K_pad <= cap:
        tk = K_pad                     # single K block (full-dim block is legal)
    else:
        n128, g = K_pad // _LANE, max(1, cap // _LANE)
        while n128 % g:                # largest 128-multiple tile dividing K_pad
            g -= 1
        tk = g * _LANE
    nk = K_pad // tk
    return feats, M, M_pad, nk, tk, denom, vmem_limit


# -------------------------------- kernels ---------------------------------- #
def _gram_partial_kernel(feat_ref, g_ref, *, inv_denom):
    """Partial Gram for one K-split, accumulated in a resident output block."""
    k = pl.program_id(1)
    f = feat_ref[...].astype(jnp.bfloat16)          # bf16 MXU feed, f32 acc
    # Contract dim 1 of both operands (F @ F^T): no explicit transpose; the
    # MXU transposed-operand feed handles the RHS (verify vs. vxpose if the
    # XLU ever binds for small M).
    part = jax.lax.dot_general(f, f, (((1,), (1,)), ((), ())),
                               preferred_element_type=jnp.float32)

    @pl.when(k == 0)
    def _():
        g_ref[0] = part                             # first block: direct write

    @pl.when(k != 0)
    def _():
        g_ref[0] += part

    @pl.when(k == pl.num_programs(1) - 1)
    def _():
        g_ref[0] = g_ref[0] * inv_denom             # G.div(a*b*c*d)


def _gram_mse_kernel(feat_ref, tgt_ref, g_ref, loss_ref, *, inv_denom, inv_n):
    """Gram accumulation with the MSE vs. target fused into the last step."""
    k = pl.program_id(0)
    f = feat_ref[...].astype(jnp.bfloat16)
    part = jax.lax.dot_general(f, f, (((1,), (1,)), ((), ())),
                               preferred_element_type=jnp.float32)

    @pl.when(k == 0)
    def _():
        g_ref[...] = part

    @pl.when(k != 0)
    def _():
        g_ref[...] += part

    @pl.when(k == pl.num_programs(0) - 1)
    def _():
        g = g_ref[...] * inv_denom
        g_ref[...] = g
        diff = g - tgt_ref[...]                     # F.mse_loss(G, target)
        loss_ref[...] = (jnp.sum(diff * diff) * inv_n).reshape(1, 1)


# ------------------------------ pallas calls -------------------------------- #
def _gram_partials(feats, M_pad, nk, tk, n_split, inv_denom, vmem_limit):
    nk_s = nk // n_split
    kernel = functools.partial(_gram_partial_kernel, inv_denom=inv_denom)
    return pl.pallas_call(
        kernel,
        out_shape=jax.ShapeDtypeStruct((n_split, M_pad, M_pad), jnp.float32),
        grid_spec=pltpu.PrefetchScalarGridSpec(
            num_scalar_prefetch=0,
            grid=(n_split, nk_s),
            in_specs=[pl.BlockSpec((M_pad, tk), lambda s, k: (0, s * nk_s + k))],
            out_specs=pl.BlockSpec((1, M_pad, M_pad), lambda s, k: (s, 0, 0)),
        ),
        compiler_params=pltpu.CompilerParams(
            dimension_semantics=("parallel", "arbitrary"),
            vmem_limit_bytes=vmem_limit),
    )(feats)


def gram_matrix(x):
    """x: (a, b, c, d) NCHW -> Gram matrix (a*b, a*b), float32."""
    feats, M, M_pad, nk, tk, denom, vmem_limit = _prep(x)
    n_split = _num_tensorcores()
    if nk % n_split:
        n_split = 1
    partials = _gram_partials(feats, M_pad, nk, tk, n_split, 1.0 / denom,
                              vmem_limit)
    G = partials[0] if n_split == 1 else jnp.sum(partials, axis=0)
    return G[:M, :M]


def gram_mse(x, target_gram):
    """Returns (G, scalar mse loss); MSE fused into the Gram pass when possible."""
    feats, M, M_pad, nk, tk, denom, vmem_limit = _prep(x)
    inv_denom, inv_n = 1.0 / denom, 1.0 / float(M * M)
    tgt = target_gram.astype(jnp.float32)
    if M_pad != M:
        tgt = jnp.pad(tgt, ((0, M_pad - M), (0, M_pad - M)))  # zeros: diff = 0

    n_split = _num_tensorcores()
    if nk % n_split:
        n_split = 1

    if n_split > 1:
        # v7x: split the K reduction across both TensorCores; the tiny (M, M)
        # partial-sum + MSE epilogue runs as plain XLA ops.
        partials = _gram_partials(feats, M_pad, nk, tk, n_split, inv_denom,
                                  vmem_limit)
        G = jnp.sum(partials, axis=0)
        diff = G - tgt
        return G[:M, :M], jnp.sum(diff * diff) * inv_n

    kernel = functools.partial(_gram_mse_kernel,
                               inv_denom=inv_denom, inv_n=inv_n)
    # TODO(synk): for very large M on v7x, single-buffer the constant-index
    # (M, M) output/target blocks (pl.Buffered(1)) to free VMEM for K blocks.
    G, loss = pl.pallas_call(
        kernel,
        out_shape=(jax.ShapeDtypeStruct((M_pad, M_pad), jnp.float32),
                   jax.ShapeDtypeStruct((1, 1), jnp.float32)),
        grid_spec=pltpu.PrefetchScalarGridSpec(
            num_scalar_prefetch=0,
            grid=(nk,),
            in_specs=[pl.BlockSpec((M_pad, tk), lambda k: (0, k)),
                      pl.BlockSpec((M_pad, M_pad), lambda k: (0, 0))],
            # Loss stays a (1,1) VMEM block: vector->SMEM scalar extraction is
            # a lowering risk and this single store per call is noise.
            out_specs=(pl.BlockSpec((M_pad, M_pad), lambda k: (0, 0)),
                       pl.BlockSpec((1, 1), lambda k: (0, 0))),
        ),
        compiler_params=pltpu.CompilerParams(
            dimension_semantics=("arbitrary",),
            vmem_limit_bytes=vmem_limit),
    )(feats, tgt)
    return G[:M, :M], loss[0, 0]


# ------------------------------- StyleLoss ---------------------------------- #
class StyleLoss:
    """JAX/Pallas equivalent of the PyTorch StyleLoss module."""

    def __init__(self, target_feature):
        # target = gram_matrix(target_feature).detach()
        self.target = jax.lax.stop_gradient(gram_matrix(target_feature))
        self.loss = None

    def __call__(self, x):
        # TODO(synk): loss stored as an attribute side-effect (like the torch
        # module); return it explicitly if it must flow through jax.jit/grad.
        _, self.loss = gram_mse(x, self.target)
        return x                                   # forward returns the input


# ---------------------------------- main ------------------------------------ #
if __name__ == "__main__":
    key = jax.random.PRNGKey(0)
    k_tgt, k_in = jax.random.split(key)

    # Small shapes consistent with the module's NCHW conv-feature inputs.
    shape = (2, 4, 16, 16)              # a=2, b=4, c=16, d=16 -> M=8, K=256
    target_feature = jax.random.normal(k_tgt, shape, dtype=jnp.float32)
    x = jax.random.normal(k_in, shape, dtype=jnp.float32)

    style = StyleLoss(target_feature)
    out = jax.block_until_ready(style(x))
    loss = jax.block_until_ready(style.loss)

    # Pure-JAX f32 reference (kernel uses bf16 MXU operands -> loose tolerance).
    def gram_ref(v):
        a, b, c, d = v.shape
        f = v.reshape(a * b, c * d).astype(jnp.float32)
        return (f @ f.T) / (a * b * c * d)

    t_ref = gram_ref(target_feature)
    g_ref = gram_ref(x)
    loss_ref = jnp.mean((g_ref - t_ref) ** 2)

    assert out.shape == x.shape and bool(jnp.all(out == x))
    assert style.target.shape == t_ref.shape
    assert jnp.allclose(style.target, t_ref, rtol=1e-2, atol=1e-3), (
        style.target, t_ref)
    assert jnp.allclose(loss, loss_ref, rtol=2e-2, atol=1e-6), (loss, loss_ref)

    print("KERNEL_OK")
</pallas_src>

<mosaic_0001>
module attributes {stable_mosaic.version = 11 : i64} {
  func.func @_gram_partial_kernel(%arg0: i32, %arg1: i32, %arg2: memref<8x256xf32, #tpu.memory_space<vmem>>, %arg3: memref<1x8x8xf32, #tpu.memory_space<vmem>>) attributes {dimension_semantics = [#tpu.dimension_semantics<parallel>, #tpu.dimension_semantics<arbitrary>], iteration_bounds = array<i64: 1, 1>, scalar_prefetch = 0 : i64, scratch_operands = 0 : i64, tpu.core_type = #tpu.core_type<tc>, window_params = [{transform_indices = @transform_0, window_bounds = array<i64: 8, 256>}, {transform_indices = @transform_1, window_bounds = array<i64: 1, 8, 8>}]} {
    %c0 = arith.constant 0 : index
    %c0_0 = arith.constant 0 : index
    %0 = vector.load %arg2[%c0, %c0_0] : memref<8x256xf32, #tpu.memory_space<vmem>>, vector<8x256xf32>
    %1 = arith.truncf %0 : vector<8x256xf32> to vector<8x256xbf16>
    %cst = arith.constant dense<0.000000e+00> : vector<8x8xf32>
    %2 = tpu.matmul %1, %1, %cst {dimension_numbers = #tpu.dot_dimension_numbers<[1], [1], [0], [0], [0, 0, 1, 0], [], []>} : vector<8x256xbf16>, vector<8x256xbf16>, vector<8x8xf32> -> vector<8x8xf32>
    %c0_i32 = arith.constant 0 : i32
    %3 = arith.cmpi eq, %arg1, %c0_i32 : i32
    %4 = arith.extui %3 : i1 to i32
    %c0_i32_1 = arith.constant 0 : i32
    %5 = arith.cmpi ne, %4, %c0_i32_1 : i32
    scf.if %5 {
      %c0_6 = arith.constant 0 : index
      %c0_7 = arith.constant 0 : index
      %c0_8 = arith.constant 0 : index
      %12 = vector.load %arg3[%c0_6, %c0_7, %c0_8] : memref<1x8x8xf32, #tpu.memory_space<vmem>>, vector<1x8x8xf32>
      %13 = vector.shape_cast %12 : vector<1x8x8xf32> to vector<8x8xf32>
      %14 = vector.shape_cast %2 : vector<8x8xf32> to vector<1x8x8xf32>
      tpu.vector_store %arg3[%c0_6, %c0_7, %c0_8], %14 {strides = array<i32>} : memref<1x8x8xf32, #tpu.memory_space<vmem>>, vector<1x8x8xf32>,
    } else {
    }
    %c0_i32_2 = arith.constant 0 : i32
    %6 = arith.cmpi ne, %arg1, %c0_i32_2 : i32
    %7 = arith.extui %6 : i1 to i32
    %c0_i32_3 = arith.constant 0 : i32
    %8 = arith.cmpi ne, %7, %c0_i32_3 : i32
    scf.if %8 {
      %c0_6 = arith.constant 0 : index
      %c0_7 = arith.constant 0 : index
      %c0_8 = arith.constant 0 : index
      %12 = vector.load %arg3[%c0_6, %c0_7, %c0_8] : memref<1x8x8xf32, #tpu.memory_space<vmem>>, vector<1x8x8xf32>
      %13 = vector.shape_cast %12 : vector<1x8x8xf32> to vector<8x8xf32>
      %14 = arith.addf %13, %2 : vector<8x8xf32>
      %c0_9 = arith.constant 0 : index
      %c0_10 = arith.constant 0 : index
      %c0_11 = arith.constant 0 : index
      %15 = vector.load %arg3[%c0_9, %c0_10, %c0_11] : memref<1x8x8xf32, #tpu.memory_space<vmem>>, vector<1x8x8xf32>
      %16 = vector.shape_cast %15 : vector<1x8x8xf32> to vector<8x8xf32>
      %17 = vector.shape_cast %14 : vector<8x8xf32> to vector<1x8x8xf32>
      tpu.vector_store %arg3[%c0_9, %c0_10, %c0_11], %17 {strides = array<i32>} : memref<1x8x8xf32, #tpu.memory_space<vmem>>, vector<1x8x8xf32>,
    } else {
    }
    %c0_i32_4 = arith.constant 0 : i32
    %9 = arith.cmpi eq, %arg1, %c0_i32_4 : i32
    %10 = arith.extui %9 : i1 to i32
    %c0_i32_5 = arith.constant 0 : i32
    %11 = arith.cmpi ne, %10, %c0_i32_5 : i32
    scf.if %11 {
      %c0_6 = arith.constant 0 : index
      %c0_7 = arith.constant 0 : index
      %c0_8 = arith.constant 0 : index
      %12 = vector.load %arg3[%c0_6, %c0_7, %c0_8] : memref<1x8x8xf32, #tpu.memory_space<vmem>>, vector<1x8x8xf32>
      %13 = vector.shape_cast %12 : vector<1x8x8xf32> to vector<8x8xf32>
      %cst_9 = arith.constant 4.8828125E-4 : f32
      %14 = vector.broadcast %cst_9 : f32 to vector<8x8xf32>
      %15 = arith.mulf %13, %14 : vector<8x8xf32>
      %c0_10 = arith.constant 0 : index
      %c0_11 = arith.constant 0 : index
      %c0_12 = arith.constant 0 : index
      %16 = vector.load %arg3[%c0_10, %c0_11, %c0_12] : memref<1x8x8xf32, #tpu.memory_space<vmem>>, vector<1x8x8xf32>
      %17 = vector.shape_cast %16 : vector<1x8x8xf32> to vector<8x8xf32>
      %18 = vector.shape_cast %15 : vector<8x8xf32> to vector<1x8x8xf32>
      tpu.vector_store %arg3[%c0_10, %c0_11, %c0_12], %18 {strides = array<i32>} : memref<1x8x8xf32, #tpu.memory_space<vmem>>, vector<1x8x8xf32>,
    } else {
    }
    return
  }
  func.func @transform_0(%arg0: i32, %arg1: i32) -> (i32, i32) {
    %c1_i32 = arith.constant 1 : i32
    %0 = arith.muli %arg0, %c1_i32 : i32
    %1 = arith.addi %0, %arg1 : i32
    %c0_i32 = arith.constant 0 : i32
    %c0_i32_0 = arith.constant 0 : i32
    return %c0_i32, %1 : i32, i32
  }
  func.func @transform_1(%arg0: i32, %arg1: i32) -> (i32, i32, i32) {
    %c0_i32 = arith.constant 0 : i32
    %c0_i32_0 = arith.constant 0 : i32
    %c0_i32_1 = arith.constant 0 : i32
    return %arg0, %c0_i32, %c0_i32_0 : i32, i32, i32
  }
}

</mosaic_0001>

<bundles_post_ra>
// kernel: tpu_custom_call.1
= control target key start
LH: loop header
LB: loop body
LE: loop exit
PB: predicated region body
PF: predicated region fallthrough
CT: control target
= control target key end

     0   :  { %6 = vsyncpa [#allocation3], 0  ;;  %s194_s0 = inlined_call_operand.hbm [shape: f32[8,256], index: 0, kind: input, shape index: {}]   ;;  %s195_s1 = inlined_call_operand.hbm [shape: f32[1,8,8], index: 1, kind: output, shape index: {}]  }
   0x1   :  { %7 = vsyncpa [#allocation4], 0  ;;  %s158_s6 = smov [#allocation2]   ;;  %s110_s10 = scalar_lea.hbm %s194_s0, 256 }
   0x2   :  { %s18_s7 = sshll.u32 %s158_s6, 4  ;;  %p111_p0 = scmp.ne.s32.totalorder %s194_s0, %s110_s10  ;;  %s19_s7 = int_to_ptr.vmem [resolvable:$true] %s18_s7 }
   0x3   :  { %p114_p1 = scmp.lt.u32.totalorder %s110_s10, %s194_s0 }
   0x5   :  { %p116_p2 = pnand %p114_p1, %p111_p0 }
   0x7   :  { %119 = shalt.err (!%p116_p2)
}
   0x8   :  { %s120_s15 = scalar_lea.vmem %s19_s7, 256  ;;  %p125_p4 = scmp.lt.s32.totalorder %s19_s7, %s19_s7 }
   0x9   :  { %p121_p3 = scmp.ne.s32.totalorder %s19_s7, %s120_s15  ;;  %p126_p5 = scmp.lt.s32.totalorder %s120_s15, %s120_s15 }
   0xb   :  { %p127_p6 = por %p126_p5, %p125_p4 }
   0xd   :  { %p128_p7 = pnand %p127_p6, %p121_p3 }
   0xf   :  { %131 = shalt.err (!%p128_p7)
}
  0x10   :  { %21 = dma.hbm_to_vmem [thread:$0]  %s194_s0, 256, %s19_s7, [#allocation3]  }
  0x11   :  { %154 = dma.done.wait [#allocation3], 256  }
  0x12   :  { %155 = vsyncadd [#allocation3], 4294967040  ;;  %v29_v0 = vld [vmem:[#allocation2 + $0x8] sm:$0xff]  ;;  %v28_v1 = vld [vmem:[#allocation2] sm:$0xff]  ;;  %vm76_vm0 = vcmask 64512   ;;  %s159_s18 = smov [#allocation5]  }
  0x13   :  { %v31_v2 = vpack.c.bf16 %v29_v0, %v29_v0  ;;  %v30_v3 = vpack.c.bf16 %v28_v1, %v28_v1  ;;  %s99_s19 = sshll.u32 %s159_s18, 4  ;;  %s100_s19 = int_to_ptr.vmem [resolvable:$true] %s99_s19 }
  0x14   :  { %s132_s0 = scalar_lea.vmem %s100_s19, 128  ;;  %p137_p9 = scmp.lt.s32.totalorder %s100_s19, %s100_s19 }
  0x15   :  { %32 = vmatprep.subr.bf16.mxu0 %v31_v2  ;;  %64 = vmatprep.mubr.bf16.mxu0 %v31_v2  ;;  %p133_p8 = scmp.ne.s32.totalorder %s100_s19, %s132_s0  ;;  %p138_p10 = scmp.lt.s32.totalorder %s132_s0, %s132_s0 }
  0x16   :  { %33 = vmatpush1.bf16.xpose.msra.mxu0 %v30_v3 }
  0x17   :  { %p139_p11 = por %p138_p10, %p137_p9 }
  0x19   :  { %p140_p12 = pnand %p139_p11, %p133_p8 }
  0x1d   :  { %65 = vmatmul.mubr.bf16.vlgmr.msra.gmra.mrb[0].mxu0 %v30_v3 }
  0xf0   :  { %v66_v4 = vpop.f32.mrb[0].mxu0 }
  0xf1   :  { %77 = vst.msk [vmem:[#allocation5] sm:$0xff] %vm76_vm0, %v66_v4  ;;  %v68_v5 = vpop.f32.mrb[1].mxu0 }
  0xf2   :  { %v69_v6 = vpop.f32.mrb[2].mxu0 }
  0xf3   :  { %v70_v7 = vpop.f32.mrb[3].mxu0 }
  0xf8   :  { %v89_v8 = vld [vmem:[#allocation5] sm:$0xff] }
  0xf9   :  { %v90_v9 = vmul.f32 0.00048828125, %v89_v8 }
  0xfb   :  { %92 = vst.msk [vmem:[#allocation5] sm:$0xff] %vm76_vm0, %v90_v9 }
  0xfc   :  { %143 = shalt.err (!%p140_p12)
}
  0xfd   :  { %s144_s22 = scalar_lea.hbm %s195_s1, 128 }
  0xfe   :  { %p145_p13 = scmp.ne.s32.totalorder %s195_s1, %s144_s22  ;;  %p148_p0 = scmp.lt.u32.totalorder %s144_s22, %s195_s1 }
 0x100   :  { %p150_p1 = pnand %p148_p0, %p145_p13 }
 0x102   :  { %153 = shalt.err (!%p150_p1)
}
 0x103   :  { %102 = dma.vmem_to_hbm [thread:$0]  %s100_s19, 128, %s195_s1, [#allocation4]  }
 0x104   :  { %156 = dma.done.wait [#allocation4], 128  }
 0x105   :  { %157 = vsyncadd [#allocation4], 4294967168 }
 0x106   :  { %106 = vsyncpa [#allocation3], 1 }
 0x107   :  { %107 = vsyncpa [#allocation4], 1 }

</bundles_post_ra>
